<compile_context>
chip_gen: v5e
topology: v5e:2x2
jax: 0.10.0
libtpu: 0.0.40
codegen_flags: <defaults>
</compile_context>

<pallas_src>
import jax
import jax.numpy as jnp
from jax.experimental import pallas as pl
from jax.experimental.pallas import tpu as pltpu


def _round_up(x, m):
    return ((x + m - 1) // m) * m


def _round_down(x, m):
    return (x // m) * m


def slp_kernel(x_ref, w_ref, b_ref, o_ref, acc_ref):
    # x_ref : (TM, TK) VMEM  streamed batch x feature tile (double-buffered)
    # w_ref : (1, TK)  VMEM  weight row tile (resident across the batch axis)
    # b_ref : (1, 1)   SMEM  scalar bias
    # o_ref : (1, TM)  VMEM  lane-dense output row for this batch tile
    # acc_ref: (1, TM) VMEM  f32 partial-sum accumulator (scratch)
    k = pl.program_id(1)

    @pl.when(k == 0)
    def _():
        acc_ref[...] = jnp.zeros_like(acc_ref)

    # (1, TK) x (TM, TK) contracted on the feature dim -> (1, TM) lane-major row:
    # full 128-lane output stores, no (TM,1)->(1,TM) relayout.
    acc_ref[...] += jax.lax.dot_general(
        w_ref[...], x_ref[...],
        dimension_numbers=(((1,), (1,)), ((), ())),
        preferred_element_type=jnp.float32,
        precision=jax.lax.Precision.HIGHEST,
    )

    @pl.when(k == pl.num_programs(1) - 1)
    def _():
        z = acc_ref[...] + b_ref[0, 0]
        o_ref[...] = jax.nn.sigmoid(z).astype(o_ref.dtype)


_TARGET_TILE_HBM_BYTES = 4 << 20   # ~4 MiB of x traffic per grid step
_MAX_TK = 4096                     # feature-tile width when D is too large to keep resident


def _vmem_budget():
    """Return (scoped vmem_limit_bytes, x double-buffer budget). Generation-aware,
    v7x-safe fallback (64 MiB/TC) if the hardware query is unavailable."""
    cap = None
    try:
        cap = getattr(pltpu.get_tpu_info(), "vmem_capacity_bytes", None)
    except Exception:
        cap = None
    if not cap or cap <= 0:
        cap = 64 << 20                                          # v7x per-TensorCore
    limit = min(max(cap - (16 << 20), 32 << 20), 96 << 20)      # 48 MiB v7x, 96 MiB v5e/v6e
    x_budget = (limit * 3) // 4                                 # headroom for w/out/acc bufs
    return limit, x_budget


def _pick_tiles(batch, d, x_budget):
    """Choose (tm, tk): batch tile and feature tile."""
    d_pad = _round_up(d, 128)

    # Feature tile: keep the full feature dim resident unless even a TM=128 tile can no
    # longer be double-buffered within the x budget (huge-D fallback -> K-tiled grid axis).
    tk_fit = _round_down(x_budget // (2 * 4 * 128), 128)
    if d_pad <= tk_fit:
        tk, tk_pad = d, d_pad
    else:
        tk = min(_MAX_TK, tk_fit)
        tk_pad = tk

    # Batch tile: large enough that each grid step moves ~4 MiB of HBM traffic (amortizes
    # the ~0.35 us per-step overhead), bounded by the lane-padded double-buffer footprint.
    tm_vmem = x_budget // (2 * 4 * tk_pad)
    tm_traffic = max(_TARGET_TILE_HBM_BYTES // (4 * min(tk, d)), 128)
    tm = max(128, _round_down(min(tm_vmem, tm_traffic), 128))

    # Keep >= ~4 batch steps when the batch is big enough: gives the BlockSpec pipeline
    # something to overlap and keeps both v7x TensorCores fed on the 'parallel' axis.
    if batch >= 4 * 128:
        tm = min(tm, max(128, _round_up(-(-batch // 4), 128)))
    if tm >= batch:
        tm = batch                                              # block == full array: legal
    return tm, tk


def single_layer_perceptron_forward(x, w, b, *, tile_m=None):
    """x: (B, D) f32, w: (D, 1) f32, b: (1, 1) f32  ->  (B, 1) f32 = sigmoid(x @ w + b)."""
    B, D = x.shape
    x = x.astype(jnp.float32)
    w_row = jnp.asarray(w, jnp.float32).reshape(1, D)           # lane-major weight row
    b_s = jnp.asarray(b, jnp.float32).reshape(1, 1)             # scalar bias for SMEM

    vmem_limit, x_budget = _vmem_budget()
    tm, tk = _pick_tiles(B, D, x_budget)
    if tile_m is not None:                                      # validated caller override
        tm = B if tile_m >= B else max(128, _round_down(int(tile_m), 128))

    # Huge-D fallback: feature dim is K-tiled; zero-pad so every K tile is fully in bounds
    # (padded columns multiply zero weights -> exact). Never triggers at the module's D=32.
    d_total = D
    if tk < D:
        d_total = _round_up(D, tk)
        if d_total != D:
            # TODO(synk): for production huge-D inputs, pad upstream / mask in-kernel
            # instead of this extra memory pass over x.
            x = jnp.pad(x, ((0, 0), (0, d_total - D)))
            w_row = jnp.pad(w_row, ((0, 0), (0, d_total - D)))

    grid = (-(-B // tm), -(-d_total // tk))
    # If B % tm != 0 the last x tile / output block is padded; garbage lands only in padded
    # output lanes, which Pallas trims from the (1, B) result on writeback.

    out_row = pl.pallas_call(
        slp_kernel,
        out_shape=jax.ShapeDtypeStruct((1, B), jnp.float32),
        grid=grid,
        in_specs=[
            pl.BlockSpec((tm, tk), lambda i, k: (i, k)),            # streamed x tile
            pl.BlockSpec((1, tk), lambda i, k: (0, k)),             # resident weight row
            pl.BlockSpec(memory_space=pltpu.MemorySpace.SMEM),      # scalar bias in SMEM
        ],
        out_specs=pl.BlockSpec((1, tm), lambda i, k: (0, i)),       # lane-dense output row
        scratch_shapes=[pltpu.VMEM((1, tm), jnp.float32)],          # f32 accumulator
        compiler_params=pltpu.CompilerParams(
            dimension_semantics=("parallel", "arbitrary"),          # batch parallel, K reduce
            vmem_limit_bytes=vmem_limit,
        ),
        cost_estimate=pl.CostEstimate(
            flops=2 * B * D,
            transcendentals=B,
            bytes_accessed=4 * B * D + 4 * (B + D),
        ),
    )(x, w_row, b_s)

    # (1, B) -> (B, 1): same element order, free reshape; matches nn.Linear output layout.
    return out_row.reshape(B, 1)


if __name__ == "__main__":
    key = jax.random.PRNGKey(0)

    # --- Small shapes consistent with the module: batch=8, input_size=32 ---------------
    batch, input_size = 8, 32
    kx, kw, kb = jax.random.split(key, 3)
    x = jax.random.normal(kx, (batch, input_size), dtype=jnp.float32)
    bound = 1.0 / jnp.sqrt(jnp.float32(input_size))
    w = jax.random.uniform(kw, (input_size, 1), minval=-bound, maxval=bound, dtype=jnp.float32)
    b = jax.random.uniform(kb, (1, 1), minval=-bound, maxval=bound, dtype=jnp.float32)

    out = single_layer_perceptron_forward(x, w, b)
    jax.block_until_ready(out)
    ref = jax.nn.sigmoid(jnp.dot(x, w, precision=jax.lax.Precision.HIGHEST) + b)
    assert out.shape == (batch, 1)
    assert jnp.allclose(out, ref, atol=1e-5, rtol=1e-5)

    # --- Explicit tile_m path: grid=(3,1), padded last batch tile -----------------------
    b2n, d2 = 300, 32
    k2x, k2w, k2b = jax.random.split(jax.random.PRNGKey(1), 3)
    x2 = jax.random.normal(k2x, (b2n, d2), dtype=jnp.float32)
    bound2 = 1.0 / jnp.sqrt(jnp.float32(d2))
    w2 = jax.random.uniform(k2w, (d2, 1), minval=-bound2, maxval=bound2, dtype=jnp.float32)
    b2 = jax.random.uniform(k2b, (1, 1), minval=-bound2, maxval=bound2, dtype=jnp.float32)
    out2 = single_layer_perceptron_forward(x2, w2, b2, tile_m=128)
    jax.block_until_ready(out2)
    ref2 = jax.nn.sigmoid(jnp.dot(x2, w2, precision=jax.lax.Precision.HIGHEST) + b2)
    assert out2.shape == (b2n, 1)
    assert jnp.allclose(out2, ref2, atol=1e-5, rtol=1e-5)

    # --- Auto-tiled path: >=4 batch steps, padded last tile -----------------------------
    b3n, d3 = 2000, 32
    k3x, k3w, k3b = jax.random.split(jax.random.PRNGKey(2), 3)
    x3 = jax.random.normal(k3x, (b3n, d3), dtype=jnp.float32)
    bound3 = 1.0 / jnp.sqrt(jnp.float32(d3))
    w3 = jax.random.uniform(k3w, (d3, 1), minval=-bound3, maxval=bound3, dtype=jnp.float32)
    b3 = jax.random.uniform(k3b, (1, 1), minval=-bound3, maxval=bound3, dtype=jnp.float32)
    out3 = single_layer_perceptron_forward(x3, w3, b3)
    jax.block_until_ready(out3)
    ref3 = jax.nn.sigmoid(jnp.dot(x3, w3, precision=jax.lax.Precision.HIGHEST) + b3)
    assert out3.shape == (b3n, 1)
    assert jnp.allclose(out3, ref3, atol=1e-5, rtol=1e-5)

    print("KERNEL_OK")
</pallas_src>

<mosaic_0001>
module attributes {stable_mosaic.version = 11 : i64} {
  func.func @slp_kernel(%arg0: i32, %arg1: i32, %arg2: memref<8x32xf32, #tpu.memory_space<vmem>>, %arg3: memref<1x32xf32, #tpu.memory_space<vmem>>, %arg4: memref<1x1xf32, #tpu.memory_space<smem>>, %arg5: memref<1x8xf32, #tpu.memory_space<vmem>>, %arg6: memref<1x8xf32, #tpu.memory_space<vmem>>) attributes {dimension_semantics = [#tpu.dimension_semantics<parallel>, #tpu.dimension_semantics<arbitrary>], iteration_bounds = array<i64: 1, 1>, scalar_prefetch = 0 : i64, scratch_operands = 1 : i64, tpu.core_type = #tpu.core_type<tc>, window_params = [{transform_indices = @transform_0, window_bounds = array<i64: 8, 32>}, {transform_indices = @transform_1, window_bounds = array<i64: 1, 32>}, {transform_indices = @transform_2, window_bounds = array<i64: 1, 1>}, {transform_indices = @transform_3, window_bounds = array<i64: 1, 8>}]} {
    %c0_i32 = arith.constant 0 : i32
    %0 = arith.cmpi eq, %arg1, %c0_i32 : i32
    %1 = arith.extui %0 : i1 to i32
    %c0_i32_0 = arith.constant 0 : i32
    %2 = arith.cmpi ne, %1, %c0_i32_0 : i32
    scf.if %2 {
      %cst_10 = arith.constant 0.000000e+00 : f32
      %12 = vector.broadcast %cst_10 : f32 to vector<1x8xf32>
      %c0_11 = arith.constant 0 : index
      %c0_12 = arith.constant 0 : index
      %13 = vector.load %arg6[%c0_11, %c0_12] : memref<1x8xf32, #tpu.memory_space<vmem>>, vector<1x8xf32>
      tpu.vector_store %arg6[%c0_11, %c0_12], %12 {strides = array<i32>} : memref<1x8xf32, #tpu.memory_space<vmem>>, vector<1x8xf32>,
    } else {
    }
    %c0 = arith.constant 0 : index
    %c0_1 = arith.constant 0 : index
    %3 = vector.load %arg6[%c0, %c0_1] : memref<1x8xf32, #tpu.memory_space<vmem>>, vector<1x8xf32>
    %c0_2 = arith.constant 0 : index
    %c0_3 = arith.constant 0 : index
    %4 = vector.load %arg3[%c0_2, %c0_3] : memref<1x32xf32, #tpu.memory_space<vmem>>, vector<1x32xf32>
    %c0_4 = arith.constant 0 : index
    %c0_5 = arith.constant 0 : index
    %5 = vector.load %arg2[%c0_4, %c0_5] : memref<8x32xf32, #tpu.memory_space<vmem>>, vector<8x32xf32>
    %cst = arith.constant dense<0.000000e+00> : vector<1x8xf32>
    %6 = tpu.matmul %4, %5, %cst {dimension_numbers = #tpu.dot_dimension_numbers<[1], [1], [0], [0], [0, 0, 1, 0], [], []>, precision = #tpu.contract_precision<fp32>} : vector<1x32xf32>, vector<8x32xf32>, vector<1x8xf32> -> vector<1x8xf32>
    %7 = arith.addf %3, %6 : vector<1x8xf32>
    %c0_6 = arith.constant 0 : index
    %c0_7 = arith.constant 0 : index
    %8 = vector.load %arg6[%c0_6, %c0_7] : memref<1x8xf32, #tpu.memory_space<vmem>>, vector<1x8xf32>
    tpu.vector_store %arg6[%c0_6, %c0_7], %7 {strides = array<i32>} : memref<1x8xf32, #tpu.memory_space<vmem>>, vector<1x8xf32>,
    %c0_i32_8 = arith.constant 0 : i32
    %9 = arith.cmpi eq, %arg1, %c0_i32_8 : i32
    %10 = arith.extui %9 : i1 to i32
    %c0_i32_9 = arith.constant 0 : i32
    %11 = arith.cmpi ne, %10, %c0_i32_9 : i32
    scf.if %11 {
      %c0_10 = arith.constant 0 : index
      %c0_11 = arith.constant 0 : index
      %12 = vector.load %arg6[%c0_10, %c0_11] : memref<1x8xf32, #tpu.memory_space<vmem>>, vector<1x8xf32>
      %c0_12 = arith.constant 0 : index
      %c0_13 = arith.constant 0 : index
      %13 = memref.load %arg4[%c0_12, %c0_13] : memref<1x1xf32, #tpu.memory_space<smem>>
      %14 = vector.broadcast %13 : f32 to vector<1x8xf32>
      %15 = arith.addf %12, %14 : vector<1x8xf32>
      %16 = arith.negf %15 : vector<1x8xf32>
      %17 = math.exp %16 : vector<1x8xf32>
      %cst_14 = arith.constant 1.000000e+00 : f32
      %18 = vector.broadcast %cst_14 : f32 to vector<1x8xf32>
      %19 = arith.addf %18, %17 : vector<1x8xf32>
      %20 = arith.divf %18, %19 : vector<1x8xf32>
      %c0_15 = arith.constant 0 : index
      %c0_16 = arith.constant 0 : index
      %21 = vector.load %arg5[%c0_15, %c0_16] : memref<1x8xf32, #tpu.memory_space<vmem>>, vector<1x8xf32>
      tpu.vector_store %arg5[%c0_15, %c0_16], %20 {strides = array<i32>} : memref<1x8xf32, #tpu.memory_space<vmem>>, vector<1x8xf32>,
    } else {
    }
    return
  }
  func.func @transform_0(%arg0: i32, %arg1: i32) -> (i32, i32) {
    %c0_i32 = arith.constant 0 : i32
    return %arg0, %arg1 : i32, i32
  }
  func.func @transform_1(%arg0: i32, %arg1: i32) -> (i32, i32) {
    %c0_i32 = arith.constant 0 : i32
    %c0_i32_0 = arith.constant 0 : i32
    return %c0_i32, %arg1 : i32, i32
  }
  func.func @transform_2(%arg0: i32, %arg1: i32) -> (i32, i32) {
    %c0_i32 = arith.constant 0 : i32
    %c0_i32_0 = arith.constant 0 : i32
    %c0_i32_1 = arith.constant 0 : i32
    return %c0_i32, %c0_i32_0 : i32, i32
  }
  func.func @transform_3(%arg0: i32, %arg1: i32) -> (i32, i32) {
    %c0_i32 = arith.constant 0 : i32
    %c0_i32_0 = arith.constant 0 : i32
    return %c0_i32, %arg0 : i32, i32
  }
}

</mosaic_0001>

<bundles_post_ra>
// kernel: tpu_custom_call.1
= control target key start
LH: loop header
LB: loop body
LE: loop exit
PB: predicated region body
PF: predicated region fallthrough
CT: control target
= control target key end

     0   :  { %9 = vsyncpa [#allocation5], 0  ;;  %s337_s0 = inlined_call_operand.hbm [shape: f32[8,32], index: 0, kind: input, shape index: {}]   ;;  %s338_s1 = inlined_call_operand.vmem [shape: f32[1,32], index: 1, kind: input, shape index: {}]   ;;  %s339_s2 = inlined_call_operand.<no memory space> [shape: f32[1,1], index: 2, kind: input, shape index: {}]   ;;  %s340_s3 = inlined_call_operand.hbm [shape: f32[1,8], index: 3, kind: output, shape index: {}]  }
   0x1   :  { %10 = vsyncpa [#allocation6], 0  ;;  %s16_s14 = sshll.u32 %s337_s0, 4  ;;  %s299_s15 = smov [#allocation4]   ;;  %s17_s14 = int_to_ptr.hbm [resolvable:$true] %s16_s14 }
   0x2   :  { %s18_s16 = sshll.u32 %s299_s15, 4  ;;  %s19_s16 = int_to_ptr.vmem [resolvable:$true] %s18_s16 }
   0x3   :  { %21 = dma.hbm_to_vmem [thread:$0]  %s17_s14, 128, %s19_s16, [#allocation5]  }
   0x4   :  { %295 = dma.done.wait [#allocation5], 128  }
   0x5   :  { %296 = vsyncadd [#allocation5], 4294967168  ;;  %vm39_vm0 = vcmask 261120   ;;  %v38_v0 = vld [vmem:[#allocation4] sm:$0xff]  ;;  %v37_v1 = vld [vmem:[%s338_s1] sm:$0x1]  ;;  %v200_v28 = vstv %s339_s2 }
   0x6   :  { %v44_v2 = vsel %vm39_vm0, %v38_v0, 0  ;;  %v41_v3 = vsel %vm39_vm0, %v37_v1, 0  ;;  %vm34_vm1 = vcmask 57344   ;;  %v300_v14 = vmov 0.0   ;;  %s301_s19 = smov [#allocation7]   ;;  %s229_s2 = sshll.u32 %s340_s3, 4  ;;  %s230_s2 = int_to_ptr.hbm [resolvable:$true] %s229_s2 }
   0x7   :  { %v61_v4 = vand.u32 4294901760, %v44_v2  ;;  %v63_v5 = vand.u32 4294901760, %v41_v3  ;;  %35 = vst.msk [vmem:[#allocation2] sm:$0x1] %vm34_vm1, %v300_v14  ;;  %s227_s20 = sshll.u32 %s301_s19, 4  ;;  %s228_s20 = int_to_ptr.vmem [resolvable:$true] %s227_s20 }
   0x9   :  { %v88_v6 = vsub.f32 %v44_v2, %v61_v4  ;;  %62 = vmatpush.xpose.msra.mxu0 %v61_v4  ;;  %138 = vmatpush.xpose.msra.mxu3 %v61_v4  ;;  %v64_v7 = vsub.f32 %v41_v3, %v63_v5 }
   0xb   :  { %115 = vmatpush.xpose.msra.mxu2 %v88_v6  ;;  %v89_v8 = vand.u32 4294901760, %v88_v6  ;;  %v65_v9 = vand.u32 4294901760, %v64_v7 }
   0xd   :  { %v90_v10 = vsub.f32 %v88_v6, %v89_v8  ;;  %v66_v11 = vsub.f32 %v64_v7, %v65_v9  ;;  %142 = vmatmul.f32.vlgmr.msra.gmra.mxu3 %v65_v9  ;;  %164 = vmatpush.xpose.msrb.mxu0 %v89_v8 }
   0xe   :  { %118 = vmatmul.f32.vlgmr.msra.gmra.mxu2 %v64_v7  ;;  %v36_v24 = vld [vmem:[#allocation2] sm:$0x1] }
   0xf   :  { %v91_v12 = vand.u32 4294901760, %v90_v10  ;;  %v67_v13 = vand.u32 4294901760, %v66_v11 }
  0x11   :  { %92 = vmatpush.xpose.msra.mxu1 %v91_v12  ;;  %68 = vmatmul.f32.vlgmr.msra.gmra.mxu0 %v67_v13 }
  0x14   :  { %94 = vmatmul.f32.vlgmr.msra.gmra.mxu1 %v63_v5 }
  0x15   :  { %186 = vmatpush.xpose.msrb.mxu1 %v61_v4 }
  0x19   :  { %166 = vmatmul.f32.vlgmr.msrb.gmra.mxu0 %v63_v5 }
  0x1c   :  { %188 = vmatmul.f32.vlgmr.msrb.gmra.mxu1 %v63_v5 }
  0x8e   :  { %v69_v15 = vpop.f32.mrf.mxu0 }
  0x90   :  { %v143_v19 = vpop.f32.mrf.mxu3 }
  0x91   :  { %v95_v16 = vpop.f32.mrf.mxu1  ;;  %v119_v17 = vpop.f32.mrf.mxu2 }
  0x92   :  { %v96_v18 = vadd.f32 %v95_v16, %v69_v15 }
  0x94   :  { %v120_v20 = vadd.f32 %v119_v17, %v96_v18 }
  0x96   :  { %v144_v21 = vadd.f32 %v143_v19, %v120_v20  ;;  %v167_v22 = vpop.f32.mrf.mxu0 }
  0x98   :  { %v168_v23 = vadd.f32 %v167_v22, %v144_v21 }
  0x99   :  { %v189_v25 = vpop.f32.mrf.mxu1 }
  0x9a   :  { %v190_v26 = vadd.f32 %v189_v25, %v168_v23 }
  0x9c   :  { %v192_v27 = vadd.f32 %v190_v26, %v36_v24 }
  0x9e   :  { %194 = vst.msk [vmem:[#allocation2] sm:$0x1] %vm34_vm1, %v192_v27 }
  0xa5   :  { %v198_v29 = vld [vmem:[#allocation2] sm:$0x1] }
  0xa6   :  { %v201_v30 = vadd.f32 %v200_v28, %v198_v29 }
  0xa8   :  { %v239_v31 = vmul.f32 -1.442695, %v201_v30 }
  0xaa   :  { %243 = vpow2.f32 %v239_v31 }
  0xb0   :  { %v244_v32 = vpop.eup %243 }
  0xb1   :  { %v205_v33 = vadd.f32 1.0, %v244_v32 }
  0xb3   :  { %245 = vrcp.f32 %v205_v33  ;;  %v217_v37 = vand.u32 2147483648, %v205_v33  ;;  %v215_v39 = vand.u32 2147483647, %v205_v33  ;;  %vm211_vm3 = vweird.f32 %v205_v33 }
  0xb5   :  { %v218_v41 = vor.u32 1.1754944e-38, %v217_v37  ;;  %vm216_vm5 = vcmp.eq.f32.partialorder %v215_v39, 8.507059e+37 }
  0xb9   :  { %v246_v34 = vpop.eup %245 }
  0xba   :  { %v207_v35 = vmul.f32 %v246_v34, %v205_v33  ;;  %vm212_vm2 = vweird.f32 %v246_v34 }
  0xbb   :  { %vm213_vm4 = vmor %vm211_vm3, %vm212_vm2 }
  0xbc   :  { %v208_v36 = vsub.f32 1.0, %v207_v35 }
  0xbe   :  { %v209_v38 = vmul.f32 %v246_v34, %v208_v36 }
  0xc0   :  { %v210_v40 = vadd.f32 %v246_v34, %v209_v38 }
  0xc2   :  { %v214_v42 = vsel %vm213_vm4, %v246_v34, %v210_v40 }
  0xc3   :  { %v219_v43 = vsel %vm216_vm5, %v218_v41, %v214_v42 }
  0xc4   :  { %221 = vst.msk [vmem:[#allocation7] sm:$0x1] %vm34_vm1, %v219_v43 }
  0xc5   :  { %232 = dma.vmem_to_hbm [thread:$0]  %s228_s20, 16, %s230_s2, [#allocation6]  }
  0xc6   :  { %297 = dma.done.wait [#allocation6], 16  }
  0xc7   :  { %298 = vsyncadd [#allocation6], 4294967280 }
  0xc8   :  { %237 = vsyncpa [#allocation5], 1 }
  0xc9   :  { %238 = vsyncpa [#allocation6], 1 }

</bundles_post_ra>
